<compile_context>
chip_gen: v6e
topology: v6e:2x2x1
jax: 0.10.0
libtpu: 0.0.40
codegen_flags: <defaults>
</compile_context>

<pallas_src>
import math

import jax
import jax.numpy as jnp
from jax import lax
from jax.experimental import pallas as pl
from jax.experimental.pallas import tpu as pltpu


def _outconv_kernel(x_ref, w_ref, b_ref, o_ref):
    # x_ref: (Bn, Cin, TM)   lane-dense pixel tile(s), one or more images
    # w_ref: (Cout, Cin)     full 1x1-conv weight
    # b_ref: (Cout, 1)       bias (broadcast over lanes)
    # o_ref: (Bn, Cout, TM)  lane-dense output tile(s), already in NCHW order
    w = w_ref[...]
    bias = b_ref[...]
    nb = x_ref.shape[0]

    def one_image(i):
        acc = jnp.dot(w, x_ref[i], preferred_element_type=jnp.float32)
        # Sigmoid runs on the EUP slot; kernel stays HBM/DMA bound.
        o_ref[i] = jax.nn.sigmoid(acc + bias).astype(o_ref.dtype)

    if nb == 1:
        one_image(0)
    else:
        def body(i, carry):
            one_image(i)
            return carry
        lax.fori_loop(0, nb, body, 0)


def outconv_forward(x_nchw, weight, bias, *, target_tile_bytes=2 * 1024 * 1024):
    """1x1 Conv2d + Sigmoid.

    x_nchw: (N, Cin, H, W); weight: (Cout, Cin) or (Cout, Cin, 1, 1); bias: (Cout,).
    """
    N, Cin, H, W = x_nchw.shape
    Cout = weight.shape[0]
    HW = H * W

    # Free reshapes only (NCHW keeps pixels contiguous per channel).
    x3 = x_nchw.reshape(N, Cin, HW)
    w2 = weight.reshape(Cout, Cin)
    b2 = bias.reshape(Cout, 1)

    # --- VMEM / bandwidth budgeting (accounts for sublane + lane padding). ---
    itemsize = jnp.dtype(x_nchw.dtype).itemsize
    sub = max(8, 32 // itemsize)                  # sublane quantum (8 f32, 16 bf16, 32 i8)
    cin_pad = -(-Cin // sub) * sub
    cout_pad = -(-Cout // sub) * sub
    row_bytes_in = cin_pad * itemsize             # physical bytes per pixel column (input)
    row_bytes_out = cout_pad * itemsize           # physical bytes per pixel column (output)

    # Pixel tile: 128-aligned slice of the lane axis sized to the byte budget.
    # Full extent only when the whole pixel row fits the budget (or HW < 128);
    # otherwise the trailing partial block is masked by Pallas on writeback.
    tm_budget = max(128, (target_tile_bytes // row_bytes_in) // 128 * 128)
    if HW < 128 or HW <= tm_budget:
        tm_eff = HW                               # full extent: always a legal block dim
    else:
        tm_eff = tm_budget                        # 128-aligned, < HW
    grid_pix = pl.cdiv(HW, tm_eff)

    # Batch images per grid step when the per-image tile is small, amortizing the
    # ~0.35 us fixed per-step cost over ~target_tile_bytes of traffic.
    tile_in_bytes = row_bytes_in * tm_eff
    bn = int(max(1, min(N, target_tile_bytes // max(tile_in_bytes, 1))))
    grid_n = pl.cdiv(N, bn)

    # Double-buffered footprint estimate (physical, padded).  With the 2 MiB
    # budget this stays ~<=10 MiB -> inside every generation's default scoped
    # VMEM; only raise the limit explicitly if a huge Cin pushes past ~12 MiB.
    lanes = -(-tm_eff // 128) * 128
    w_lanes = -(-Cin // 128) * 128
    est_vmem = (2 * bn * lanes * (row_bytes_in + row_bytes_out)
                + 2 * cout_pad * w_lanes * itemsize
                + 2 * cout_pad * 128 * itemsize)
    vmem_limit = None
    if est_vmem > (12 << 20):
        vmem_limit = int(min(est_vmem + (4 << 20), 60 << 20))   # keep headroom, < v7x 64 MiB

    out3 = pl.pallas_call(
        _outconv_kernel,
        out_shape=jax.ShapeDtypeStruct((N, Cout, HW), x_nchw.dtype),
        grid_spec=pltpu.PrefetchScalarGridSpec(
            num_scalar_prefetch=0,
            # Pixel axis leads so megacore sharding stays balanced when N is 1/odd.
            grid=(grid_pix, grid_n),
            in_specs=[
                pl.BlockSpec((bn, Cin, tm_eff), lambda p, n: (n, 0, p)),
                pl.BlockSpec((Cout, Cin), lambda p, n: (0, 0)),
                pl.BlockSpec((Cout, 1), lambda p, n: (0, 0)),
            ],
            out_specs=pl.BlockSpec((bn, Cout, tm_eff), lambda p, n: (n, 0, p)),
        ),
        compiler_params=pltpu.CompilerParams(
            dimension_semantics=("parallel", "parallel"),
            vmem_limit_bytes=vmem_limit),
    )(x3, w2, b2)

    return out3.reshape(N, Cout, H, W)


if __name__ == "__main__":
    # Small shapes consistent with the module.
    N, Cin, Cout, H, W = 2, 4, 3, 16, 16

    key = jax.random.PRNGKey(0)
    kx, kw, kb = jax.random.split(key, 3)

    x = jax.random.normal(kx, (N, Cin, H, W), dtype=jnp.float32)

    # Deterministic params mimicking nn.Conv2d default init (U(+/- 1/sqrt(fan_in))).
    fan_in = Cin * 1 * 1
    bound = 1.0 / math.sqrt(fan_in)
    weight = jax.random.uniform(kw, (Cout, Cin), minval=-bound, maxval=bound,
                                dtype=jnp.float32)
    bias = jax.random.uniform(kb, (Cout,), minval=-bound, maxval=bound,
                              dtype=jnp.float32)

    out = outconv_forward(x, weight, bias)
    jax.block_until_ready(out)

    # Reference check in plain JAX (1x1 conv == channel matmul).
    ref = jax.nn.sigmoid(
        jnp.einsum("nchw,oc->nohw", x, weight) + bias[None, :, None, None])
    assert out.shape == (N, Cout, H, W)
    assert jnp.allclose(out, ref, atol=1e-5, rtol=1e-5)

    print("KERNEL_OK")
</pallas_src>

<mosaic_0001>
module attributes {stable_mosaic.version = 11 : i64} {
  func.func @_outconv_kernel(%arg0: i32, %arg1: i32, %arg2: memref<2x4x256xf32, #tpu.memory_space<vmem>>, %arg3: memref<3x4xf32, #tpu.memory_space<vmem>>, %arg4: memref<3x1xf32, #tpu.memory_space<vmem>>, %arg5: memref<2x3x256xf32, #tpu.memory_space<vmem>>) attributes {dimension_semantics = [#tpu.dimension_semantics<parallel>, #tpu.dimension_semantics<parallel>], iteration_bounds = array<i64: 1, 1>, scalar_prefetch = 0 : i64, scratch_operands = 0 : i64, tpu.core_type = #tpu.core_type<tc>, window_params = [{transform_indices = @transform_0, window_bounds = array<i64: 2, 4, 256>}, {pipeline_mode = #tpu.pipeline_mode<synchronous>, transform_indices = @transform_1, window_bounds = array<i64: 3, 4>}, {pipeline_mode = #tpu.pipeline_mode<synchronous>, transform_indices = @transform_2, window_bounds = array<i64: 3, 1>}, {transform_indices = @transform_3, window_bounds = array<i64: 2, 3, 256>}]} {
    %c0 = arith.constant 0 : index
    %c0_0 = arith.constant 0 : index
    %0 = vector.load %arg3[%c0, %c0_0] : memref<3x4xf32, #tpu.memory_space<vmem>>, vector<3x4xf32>
    %c0_1 = arith.constant 0 : index
    %c0_2 = arith.constant 0 : index
    %1 = vector.load %arg4[%c0_1, %c0_2] : memref<3x1xf32, #tpu.memory_space<vmem>>, vector<3x1xf32>
    %c0_i32 = arith.constant 0 : i32
    %c2_i32 = arith.constant 2 : i32
    %2 = arith.addi %c0_i32, %c2_i32 : i32
    %c1_i32 = arith.constant 1 : i32
    scf.for %arg6 = %c0_i32 to %2 step %c1_i32  : i32 {
      %3 = arith.index_cast %arg6 : i32 to index
      %c0_4 = arith.constant 0 : index
      %c0_5 = arith.constant 0 : index
      %4 = vector.load %arg2[%3, %c0_4, %c0_5] : memref<2x4x256xf32, #tpu.memory_space<vmem>>, vector<1x4x256xf32>
      %5 = vector.shape_cast %4 : vector<1x4x256xf32> to vector<4x256xf32>
      %cst = arith.constant dense<0.000000e+00> : vector<3x256xf32>
      %6 = tpu.matmul %0, %5, %cst {dimension_numbers = #tpu.dot_dimension_numbers<[1], [0], [0], [1], [0, 0, 1, 1], [], []>} : vector<3x4xf32>, vector<4x256xf32>, vector<3x256xf32> -> vector<3x256xf32>
      %7 = vector.broadcast %1 : vector<3x1xf32> to vector<3x256xf32>
      %8 = arith.addf %6, %7 : vector<3x256xf32>
      %9 = arith.negf %8 : vector<3x256xf32>
      %10 = math.exp %9 : vector<3x256xf32>
      %cst_6 = arith.constant 1.000000e+00 : f32
      %11 = vector.broadcast %cst_6 : f32 to vector<3x256xf32>
      %12 = arith.addf %11, %10 : vector<3x256xf32>
      %13 = arith.divf %11, %12 : vector<3x256xf32>
      %14 = arith.index_cast %arg6 : i32 to index
      %c0_7 = arith.constant 0 : index
      %c0_8 = arith.constant 0 : index
      %15 = vector.load %arg5[%14, %c0_7, %c0_8] : memref<2x3x256xf32, #tpu.memory_space<vmem>>, vector<1x3x256xf32>
      %16 = vector.shape_cast %15 : vector<1x3x256xf32> to vector<3x256xf32>
      %17 = vector.shape_cast %13 : vector<3x256xf32> to vector<1x3x256xf32>
      tpu.vector_store %arg5[%14, %c0_7, %c0_8], %17 {strides = array<i32>} : memref<2x3x256xf32, #tpu.memory_space<vmem>>, vector<1x3x256xf32>,
    }
    %c2_i32_3 = arith.constant 2 : i32
    return
  }
  func.func @transform_0(%arg0: i32, %arg1: i32) -> (i32, i32, i32) {
    %c0_i32 = arith.constant 0 : i32
    %c0_i32_0 = arith.constant 0 : i32
    return %arg1, %c0_i32, %arg0 : i32, i32, i32
  }
  func.func @transform_1(%arg0: i32, %arg1: i32) -> (i32, i32) {
    %c0_i32 = arith.constant 0 : i32
    %c0_i32_0 = arith.constant 0 : i32
    %c0_i32_1 = arith.constant 0 : i32
    return %c0_i32, %c0_i32_0 : i32, i32
  }
  func.func @transform_2(%arg0: i32, %arg1: i32) -> (i32, i32) {
    %c0_i32 = arith.constant 0 : i32
    %c0_i32_0 = arith.constant 0 : i32
    %c0_i32_1 = arith.constant 0 : i32
    return %c0_i32, %c0_i32_0 : i32, i32
  }
  func.func @transform_3(%arg0: i32, %arg1: i32) -> (i32, i32, i32) {
    %c0_i32 = arith.constant 0 : i32
    %c0_i32_0 = arith.constant 0 : i32
    return %arg1, %c0_i32, %arg0 : i32, i32, i32
  }
}

</mosaic_0001>

<bundles_post_ra>
// kernel: tpu_custom_call.1
= control target key start
LH: loop header
LB: loop body
LE: loop exit
PB: predicated region body
PF: predicated region fallthrough
CT: control target
= control target key end

     0   :  { %8 = vsyncpa [#allocation3], 0  ;;  %s223_s12 = smov [#allocation2]   ;;  %s269_s0 = inlined_call_operand.hbm [shape: f32[2,4,256], index: 0, kind: input, shape index: {}]   ;;  %s270_s1 = inlined_call_operand.vmem [shape: f32[3,4], index: 1, kind: input, shape index: {}]   ;;  %s271_s2 = inlined_call_operand.vmem [shape: f32[3,1], index: 2, kind: input, shape index: {}]   ;;  %s272_s3 = inlined_call_operand.vmem [shape: f32[2,3,256], index: 3, kind: output, shape index: {}]  }
   0x1   :  { %s14_s13 = sshll.u32 %s223_s12, 4  ;;  %s15_s13 = int_to_ptr.vmem [resolvable:$true] %s14_s13 }
   0x2   :  { %s201_s14 = scalar_lea.vmem %s15_s13, 256  ;;  %p206_p1 = scmp.lt.s32.totalorder %s15_s13, %s15_s13 }
   0x3   :  { %p202_p0 = scmp.ne.s32.totalorder %s15_s13, %s201_s14  ;;  %p207_p2 = scmp.lt.s32.totalorder %s201_s14, %s201_s14 }
   0x5   :  { %p208_p3 = por %p207_p2, %p206_p1 }
   0x7   :  { %p209_p4 = pnand %p208_p3, %p202_p0 }
   0x9   :  { %212 = shalt.err (!%p209_p4)
}
   0xa   :  { %s224_s15 = smov 128   ;;  %s225_s16 = smov 8  }
   0xb   :  { %20 = dma.hbm_to_vmem [thread:$0]  %s269_s0, 256, %s15_s13, [#allocation3], %s224_s15, %s224_s15, %s225_s16  }
   0xc   :  { %217 = dma.done.wait [#allocation3], 256  }
   0xd   :  { %218 = vsyncadd [#allocation3], 4294967040  ;;  %v28_v0 = vld [vmem:[%s270_s1] sm:$0x7]  ;;  %s257_s23 = smov 0  }
   0xe   :  { %v29_v1 = vld [vmem:[%s271_s2] sm:$0x7] }
   0xf LB: > { %v226_v2 = vmov 0.0   ;;  %v227_v3 = vmov 0   ;;  %s168_s0 = sshll.u32 %s221_s23, 3  ;;  %vm51_vm0 = vcmask 1043456   ;;  %vm47_vm1 = vcmask 31744   ;;  %s35_s23 = sadd.s32 1, %s221_s23   ;;  %s221_s23 = sphi %s257_s23, %s35_s23  }
  0x10   : > { %120 = vmatprep.mubr.f32.mxu0 %v226_v2  ;;  %183 = vset.pattern.permute.xlu0 %v227_v3  ;;  %s38_s24 = scalar_lea.vmem [#allocation2], %s168_s0  ;;  %s144_s25 = scalar_lea.vmem %s272_s3, %s168_s0 }
  0x11   : > { %42 = vperm.xlu0 %183, %v29_v1   ;;  %v39_v4 = vld [vmem:[%s38_s24] sm:$0xff]  ;;  %p32_p5 = scmp.ge.s32.totalorder %s35_s23, 2  }
  0x12   : > { %v46_v5 = vcombine.high %v39_v4, %v39_v4 }
  0x14   : > { %162 = vmatprep.subr.msk.mxu0 %vm51_vm0, %v46_v5 }
  0x15   : > { %163 = vmatpush1.msk.msra.mxu0 %vm51_vm0, %v39_v4 }
  0x16   : > { %164 = vmatmul.mubr.msk.f32.vlgmr.msra.gmra.mxu0 %vm47_vm1, %v28_v0 }
  0x8c   : > { %v43_v6 = vpop.permute.xlu0 %42 }
  0xd6   : > { %v122_v7 = vpop.f32.mrf.mxu0 }
  0xd7   : > { %v123_v8 = vadd.f32 %v122_v7, %v43_v6 }
  0xd8   : > { %v124_v9 = vpop.f32.mrf.mxu0 }
  0xd9   : > { %v165_v10 = vmul.f32 -1.442695, %v123_v8  ;;  %v125_v11 = vadd.f32 %v124_v9, %v43_v6 }
  0xdb   : > { %185 = vpow2.f32 %v165_v10  ;;  %v166_v12 = vmul.f32 -1.442695, %v125_v11 }
  0xdd   : > { %187 = vpow2.f32 %v166_v12 }
  0xe8   : > { %v186_v13 = vpop.eup %185 }
  0xe9   : > { %v133_v14 = vadd.f32 1.0, %v186_v13 }
  0xea   : > { %v188_v15 = vpop.eup %187 }
  0xeb   : > { %v134_v16 = vadd.f32 1.0, %v188_v15  ;;  %189 = vrcp.f32 %v133_v14 }
  0xed   : > { %191 = vrcp.f32 %v134_v16 }
  0xf8   : > { %v190_v17 = vpop.eup %189 }
  0xf9   :  { %34 = sbr.rel (!%p32_p5) target bundleno = 15 (0xf), region = 45 }
  0xfa   : > { %v192_v18 = vpop.eup %191 }
  0xfb   : > { %v141_v19 = vcombine.low %v190_v17, %v192_v18 }
  0xfd   : > { %145 = vst [vmem:[%s144_s25] sm:$0x77] %v141_v19 }
  0xfe   :  { %150 = vsyncpa [#allocation3], 1 }

</bundles_post_ra>
